<compile_context>
chip_gen: v5e
topology: v5e:2x2
jax: 0.10.0
libtpu: 0.0.40
codegen_flags: <defaults>
</compile_context>

<pallas_src>
import jax
import jax.numpy as jnp
from jax.experimental import pallas as pl
from jax.experimental.pallas import tpu as pltpu

LANE = 128
SUBLANE = 8


def _round_up(x, m):
    return ((x + m - 1) // m) * m


def _vmem_budget_bytes():
    """Half of the per-core VMEM capacity (generation-aware)."""
    try:
        cap = int(pltpu.get_tpu_info().vmem_capacity_bytes)
    except Exception:
        cap = 64 * 1024 * 1024          # conservative: v7x per-TensorCore VMEM
    return max(cap // 2, 16 * 1024 * 1024)


# --------------------------------------------------------------------------
# One-time data-dependent init: loc = -mean, scale = 1/(std + 1e-6)
# --------------------------------------------------------------------------
def actnorm_init_kernel(x_ref, loc_ref, scale_ref):
    """Per-channel mean / unbiased std over the batch axis for one channel tile."""
    x = x_ref[...].astype(jnp.float32)                        # (B, tile_c)
    b = x.shape[0]
    # torch.std (unbiased) returns NaN for B == 1; we guard with denom = 1.
    denom = jnp.float32(b - 1 if b > 1 else 1)
    mean = jnp.mean(x, axis=0, keepdims=True)                  # (1, tile_c)
    var = jnp.sum((x - mean) ** 2, axis=0, keepdims=True) / denom
    std = jnp.sqrt(var)
    loc_ref[...] = (-mean).astype(loc_ref.dtype)
    scale_ref[...] = (1.0 / (std + 1e-6)).astype(scale_ref.dtype)


def _init_stats(x, loc_dtype, scale_dtype, vmem_budget):
    """Data-dependent (loc, scale) statistics — runs once per model lifetime."""
    B, C = x.shape
    itemsize = jnp.dtype(x.dtype).itemsize

    # Channel tile for the init pass: whole batch per block, lane-dense tile.
    target = min(4 * 1024 * 1024, vmem_budget // 4)
    if C <= LANE:
        tile_c = C
    else:
        lanes = max(LANE, (target // max(B * itemsize, 1)) // LANE * LANE)
        tile_c = min((C // LANE) * LANE, lanes)

    block_bytes = B * tile_c * itemsize
    if 2 * block_bytes > vmem_budget:
        # Batch too large to hold even a (B, 128) column block double-buffered.
        # Init runs once per model lifetime, so a plain-JAX fallback is fine.
        xf = x.astype(jnp.float32)
        mean = jnp.mean(xf, axis=0, keepdims=True)
        denom = jnp.float32(max(B - 1, 1))
        std = jnp.sqrt(jnp.sum((xf - mean) ** 2, axis=0, keepdims=True) / denom)
        return (-mean).astype(loc_dtype), (1.0 / (std + 1e-6)).astype(scale_dtype)

    param_bytes = jnp.dtype(loc_dtype).itemsize + jnp.dtype(scale_dtype).itemsize
    vmem_need = 2 * block_bytes + 2 * tile_c * param_bytes
    vmem_limit = int(min(vmem_budget, max(2 * vmem_need, 16 * 1024 * 1024)))

    loc, scale = pl.pallas_call(
        actnorm_init_kernel,
        out_shape=(
            jax.ShapeDtypeStruct((1, C), loc_dtype),
            jax.ShapeDtypeStruct((1, C), scale_dtype),
        ),
        grid_spec=pltpu.PrefetchScalarGridSpec(
            num_scalar_prefetch=0,
            grid=(pl.cdiv(C, tile_c),),
            in_specs=[pl.BlockSpec((B, tile_c), lambda i: (0, i))],
            out_specs=[
                pl.BlockSpec((1, tile_c), lambda i: (0, i)),
                pl.BlockSpec((1, tile_c), lambda i: (0, i)),
            ],
        ),
        compiler_params=pltpu.CompilerParams(
            dimension_semantics=("parallel",),
            vmem_limit_bytes=vmem_limit,
        ),
    )(x)
    return loc, scale


# --------------------------------------------------------------------------
# Steady-state streaming affine: y = scale * (x + loc)
# --------------------------------------------------------------------------
def actnorm_affine_kernel(x_ref, loc_ref, scale_ref, y_ref):
    # Compute in f32 (cast on load / cast on store): free under the HBM
    # roofline and matches the reference form exactly (no distributed bias).
    x = x_ref[...].astype(jnp.float32)                         # (tile_b, tile_c)
    loc = loc_ref[...].astype(jnp.float32)                     # (1, tile_c)
    scale = scale_ref[...].astype(jnp.float32)                 # (1, tile_c)
    y_ref[...] = (scale * (x + loc)).astype(y_ref.dtype)


def _pick_tiles(B, C, itemsize, vmem_budget):
    """Choose (tile_b, tile_c) for the streaming kernel.

    Constraints: tile_c multiple of 128 or == C; tile_b multiple of 8 or == B;
    tiles never exceed the array dims (ragged LAST blocks only).  Targets
    ~2 MiB of x per block: big enough to amortize the ~0.35us per-step cost,
    small enough that x (3 bufs) + y (2 bufs) + params fit every generation.
    """
    target_bytes = max(min(2 * 1024 * 1024, vmem_budget // 8), 64 * 1024)
    target_elems = max(target_bytes // itemsize, SUBLANE * LANE)

    # Channel (lane) tile.
    if C <= LANE:
        tile_c = C
    else:
        max_lanes = max(LANE, (target_elems // SUBLANE) // LANE * LANE)
        tile_c = min((C // LANE) * LANE, max_lanes)

    # Batch (sublane) tile.
    rows = max(SUBLANE, (target_elems // tile_c) // SUBLANE * SUBLANE)
    tile_b = B if B <= rows else rows

    # Megacore: make sure there are >= 2 grid steps whenever the shape allows.
    if pl.cdiv(B, tile_b) * pl.cdiv(C, tile_c) < 2:
        if C > LANE:
            tile_c = max(LANE, _round_up(pl.cdiv(C, 2), LANE))
        elif B > SUBLANE:
            tile_b = max(SUBLANE, _round_up(pl.cdiv(B, 2), SUBLANE))
    return tile_b, tile_c


def _x_block_spec(tile_b, tile_c):
    index_map = lambda j, i: (i, j)
    if hasattr(pl, "Buffered"):
        try:
            return pl.BlockSpec((tile_b, tile_c), index_map,
                                pipeline_mode=pl.Buffered(3))
        except TypeError:
            pass
    return pl.BlockSpec((tile_b, tile_c), index_map)


def actnorm_forward(x, loc, scale, initialized):
    """x: (B, C); loc, scale: (1, C); initialized: Python int/bool (0 or 1).

    Returns (y, logdet, new_loc, new_scale).  On the init call new_loc /
    new_scale carry the data-dependent statistics; persist them like the
    PyTorch parameters.  The init decision is a host-side branch, mirroring
    `self.initialized.item() == 0` in the PyTorch module.
    """
    B, C = x.shape
    assert loc.shape == (1, C) and scale.shape == (1, C)
    budget = _vmem_budget_bytes()

    if not bool(initialized):
        new_loc, new_scale = _init_stats(x, loc.dtype, scale.dtype, budget)
    else:
        new_loc, new_scale = loc, scale

    itemsize = jnp.dtype(x.dtype).itemsize
    param_bytes = (jnp.dtype(new_loc.dtype).itemsize
                   + jnp.dtype(new_scale.dtype).itemsize)
    tile_b, tile_c = _pick_tiles(B, C, itemsize, budget)

    # Grid: channel tiles (slow) x batch tiles (fast).  Params are indexed only
    # by the slow axis, so they are DMA'd once per channel tile.
    grid = (pl.cdiv(C, tile_c), pl.cdiv(B, tile_b))

    vmem_need = (3 * tile_b * tile_c * itemsize      # x, up to 3-deep buffered
                 + 2 * tile_b * tile_c * itemsize    # y, double-buffered
                 + 2 * tile_c * param_bytes)         # loc/scale
    vmem_limit = int(min(budget, max(2 * vmem_need, 16 * 1024 * 1024)))

    cost = pl.CostEstimate(
        flops=2 * B * C,
        transcendentals=0,
        bytes_accessed=int(2 * B * C * itemsize + C * param_bytes),
    )

    y = pl.pallas_call(
        actnorm_affine_kernel,
        out_shape=jax.ShapeDtypeStruct((B, C), x.dtype),
        grid_spec=pltpu.PrefetchScalarGridSpec(
            num_scalar_prefetch=0,
            grid=grid,
            in_specs=[
                _x_block_spec(tile_b, tile_c),
                pl.BlockSpec((1, tile_c), lambda j, i: (0, j)),
                pl.BlockSpec((1, tile_c), lambda j, i: (0, j)),
            ],
            out_specs=pl.BlockSpec((tile_b, tile_c), lambda j, i: (i, j)),
        ),
        compiler_params=pltpu.CompilerParams(
            dimension_semantics=("parallel", "parallel"),
            vmem_limit_bytes=vmem_limit,
        ),
        cost_estimate=cost,
    )(x, new_loc, new_scale)

    # logdet is tiny: computed in the wrapper over exactly C channels (f32).
    logdet = jnp.sum(jnp.log(jnp.abs(new_scale.astype(jnp.float32))))
    return y, logdet, new_loc, new_scale


# --------------------------------------------------------------------------
if __name__ == "__main__":
    key0, key1 = jax.random.split(jax.random.PRNGKey(0))

    def reference(x):
        b = x.shape[0]
        mean = jnp.mean(x, axis=0, keepdims=True)
        std = jnp.sqrt(jnp.sum((x - mean) ** 2, axis=0, keepdims=True)
                       / jnp.float32(max(b - 1, 1)))
        ref_scale = 1.0 / (std + 1e-6)
        ref_loc = -mean
        ref_y = ref_scale * (x + ref_loc)
        ref_ld = jnp.sum(jnp.log(jnp.abs(ref_scale)))
        return ref_y, ref_ld, ref_loc, ref_scale

    # ---- small, tile-aligned case (matches module defaults) ----
    B, C = 8, 32
    x = jax.random.normal(key0, (B, C), dtype=jnp.float32)
    loc0 = jnp.zeros((1, C), jnp.float32)      # nn.Parameter defaults
    scale0 = jnp.ones((1, C), jnp.float32)

    # First call: initialized == 0 -> data-dependent init (returned).
    y0, ld0, loc1, scale1 = actnorm_forward(x, loc0, scale0, initialized=0)
    jax.block_until_ready((y0, ld0, loc1, scale1))
    # Second call: initialized == 1 -> reuses the persisted parameters.
    y1, ld1, _, _ = actnorm_forward(x, loc1, scale1, initialized=1)
    jax.block_until_ready((y1, ld1))

    ref_y, ref_ld, ref_loc, ref_scale = reference(x)
    assert jnp.allclose(y0, ref_y, atol=1e-5, rtol=1e-5)
    assert jnp.allclose(ld0, ref_ld, atol=1e-5, rtol=1e-5)
    assert jnp.allclose(loc1, ref_loc, atol=1e-5, rtol=1e-5)
    assert jnp.allclose(scale1, ref_scale, atol=1e-4, rtol=1e-5)
    assert jnp.allclose(y1, y0, atol=1e-5, rtol=1e-5)
    assert jnp.allclose(ld1, ld0, atol=1e-5, rtol=1e-5)

    # Steady-state identity path (loc=0, scale=1).
    y_id, ld_id, _, _ = actnorm_forward(x, loc0, scale0, initialized=1)
    assert jnp.allclose(y_id, x, atol=1e-6)
    assert jnp.allclose(ld_id, 0.0, atol=1e-6)

    # ---- ragged case: C not a multiple of the lane tile (masked last blocks,
    #      no pad/slice in the wrapper) ----
    B2, C2 = 20, 300
    x2 = jax.random.normal(key1, (B2, C2), dtype=jnp.float32)
    loc2 = jnp.zeros((1, C2), jnp.float32)
    scale2 = jnp.ones((1, C2), jnp.float32)
    y2, ld2, loc3, scale3 = actnorm_forward(x2, loc2, scale2, initialized=0)
    jax.block_until_ready((y2, ld2, loc3, scale3))
    ref_y2, ref_ld2, ref_loc2, ref_scale2 = reference(x2)
    assert jnp.allclose(y2, ref_y2, atol=1e-5, rtol=1e-5)
    assert jnp.allclose(ld2, ref_ld2, atol=1e-4, rtol=1e-5)
    assert jnp.allclose(loc3, ref_loc2, atol=1e-5, rtol=1e-5)
    assert jnp.allclose(scale3, ref_scale2, atol=1e-4, rtol=1e-5)

    print("KERNEL_OK")
</pallas_src>

<mosaic_0001>
module attributes {stable_mosaic.version = 11 : i64} {
  func.func @actnorm_init_kernel(%arg0: i32, %arg1: memref<8x32xf32, #tpu.memory_space<vmem>>, %arg2: memref<1x32xf32, #tpu.memory_space<vmem>>, %arg3: memref<1x32xf32, #tpu.memory_space<vmem>>) attributes {dimension_semantics = [#tpu.dimension_semantics<parallel>], iteration_bounds = array<i64: 1>, scalar_prefetch = 0 : i64, scratch_operands = 0 : i64, tpu.core_type = #tpu.core_type<tc>, window_params = [{transform_indices = @transform_0, window_bounds = array<i64: 8, 32>}, {transform_indices = @transform_1, window_bounds = array<i64: 1, 32>}, {transform_indices = @transform_2, window_bounds = array<i64: 1, 32>}]} {
    %c0 = arith.constant 0 : index
    %c0_0 = arith.constant 0 : index
    %0 = vector.load %arg1[%c0, %c0_0] : memref<8x32xf32, #tpu.memory_space<vmem>>, vector<8x32xf32>
    %cst = arith.constant dense<0.000000e+00> : vector<32xf32>
    %1 = vector.multi_reduction <add>, %0, %cst [0] : vector<8x32xf32> to vector<32xf32>
    %2 = vector.shape_cast %1 : vector<32xf32> to vector<1x32xf32>
    %cst_1 = arith.constant 8.000000e+00 : f32
    %3 = vector.broadcast %cst_1 : f32 to vector<1x32xf32>
    %4 = arith.divf %2, %3 : vector<1x32xf32>
    %5 = vector.broadcast %4 : vector<1x32xf32> to vector<8x32xf32>
    %6 = arith.subf %0, %5 : vector<8x32xf32>
    %7 = arith.mulf %6, %6 : vector<8x32xf32>
    %cst_2 = arith.constant dense<0.000000e+00> : vector<32xf32>
    %8 = vector.multi_reduction <add>, %7, %cst_2 [0] : vector<8x32xf32> to vector<32xf32>
    %9 = vector.shape_cast %8 : vector<32xf32> to vector<1x32xf32>
    %cst_3 = arith.constant 7.000000e+00 : f32
    %10 = vector.broadcast %cst_3 : f32 to vector<1x32xf32>
    %11 = arith.divf %9, %10 : vector<1x32xf32>
    %12 = math.sqrt %11 : vector<1x32xf32>
    %cst_4 = arith.constant 0.000000e+00 : f32
    %13 = vector.broadcast %cst_4 : f32 to vector<1x32xf32>
    %14 = arith.subf %13, %4 : vector<1x32xf32>
    %c0_5 = arith.constant 0 : index
    %c0_6 = arith.constant 0 : index
    %15 = vector.load %arg2[%c0_5, %c0_6] : memref<1x32xf32, #tpu.memory_space<vmem>>, vector<1x32xf32>
    tpu.vector_store %arg2[%c0_5, %c0_6], %14 {strides = array<i32>} : memref<1x32xf32, #tpu.memory_space<vmem>>, vector<1x32xf32>,
    %cst_7 = arith.constant 9.99999997E-7 : f32
    %16 = vector.broadcast %cst_7 : f32 to vector<1x32xf32>
    %17 = arith.addf %12, %16 : vector<1x32xf32>
    %cst_8 = arith.constant 1.000000e+00 : f32
    %18 = vector.broadcast %cst_8 : f32 to vector<1x32xf32>
    %19 = arith.divf %18, %17 : vector<1x32xf32>
    %c0_9 = arith.constant 0 : index
    %c0_10 = arith.constant 0 : index
    %20 = vector.load %arg3[%c0_9, %c0_10] : memref<1x32xf32, #tpu.memory_space<vmem>>, vector<1x32xf32>
    tpu.vector_store %arg3[%c0_9, %c0_10], %19 {strides = array<i32>} : memref<1x32xf32, #tpu.memory_space<vmem>>, vector<1x32xf32>,
    return
  }
  func.func @transform_0(%arg0: i32) -> (i32, i32) {
    %c0_i32 = arith.constant 0 : i32
    %c0_i32_0 = arith.constant 0 : i32
    return %c0_i32, %arg0 : i32, i32
  }
  func.func @transform_1(%arg0: i32) -> (i32, i32) {
    %c0_i32 = arith.constant 0 : i32
    %c0_i32_0 = arith.constant 0 : i32
    return %c0_i32, %arg0 : i32, i32
  }
  func.func @transform_2(%arg0: i32) -> (i32, i32) {
    %c0_i32 = arith.constant 0 : i32
    %c0_i32_0 = arith.constant 0 : i32
    return %c0_i32, %arg0 : i32, i32
  }
}

</mosaic_0001>

<bundles_post_ra>
// kernel: tpu_custom_call.1
= control target key start
LH: loop header
LB: loop body
LE: loop exit
PB: predicated region body
PF: predicated region fallthrough
CT: control target
= control target key end

     0   :  { %8 = vsyncpa [#allocation3], 0  ;;  %s249_s0 = inlined_call_operand.hbm [shape: f32[8,32], index: 0, kind: input, shape index: {}]   ;;  %s250_s1 = inlined_call_operand.hbm [shape: f32[1,32], index: 1, kind: output, shape index: {0}]   ;;  %s251_s2 = inlined_call_operand.hbm [shape: f32[1,32], index: 2, kind: output, shape index: {1}]  }
   0x1   :  { %9 = vsyncpa [#allocation4], 0 }
   0x2   :  { %10 = vsyncpa [#allocation7], 0  ;;  %s16_s11 = sshll.u32 %s249_s0, 4  ;;  %s216_s12 = smov [#allocation2]   ;;  %s17_s11 = int_to_ptr.hbm [resolvable:$true] %s16_s11 }
   0x3   :  { %s18_s13 = sshll.u32 %s216_s12, 4  ;;  %s19_s13 = int_to_ptr.vmem [resolvable:$true] %s18_s13 }
   0x4   :  { %21 = dma.hbm_to_vmem [thread:$0]  %s17_s11, 128, %s19_s13, [#allocation3]  }
   0x5   :  { %210 = dma.done.wait [#allocation3], 128  }
   0x6   :  { %211 = vsyncadd [#allocation3], 4294967168  ;;  %v217_v0 = vmov 8.0   ;;  %vm27_vm0 = vcmask 261120   ;;  %v26_v2 = vld [vmem:[#allocation2] sm:$0xff]  ;;  %v218_v9 = vmov 7.0  }
   0x7   :  { %130 = vrcp.f32 %v217_v0  ;;  %v28_v3 = vsel %vm27_vm0, %v26_v2, 0.0  ;;  %s219_s0 = smov [#allocation5]   ;;  %s99_s17 = sshll.u32 %s250_s1, 4  ;;  %vm73_vm2 = vcmask 253952   ;;  %s100_s17 = int_to_ptr.hbm [resolvable:$true] %s99_s17 }
   0x8   :  { %v29_v5 = vrot.slane %v28_v3, 4  ;;  %132 = vrcp.f32 %v218_v9  ;;  %s97_s14 = sshll.u32 %s219_s0, 4  ;;  %s220_s1 = smov [#allocation6]   ;;  %s98_s14 = int_to_ptr.vmem [resolvable:$true] %s97_s14 }
   0x9   :  { %s108_s18 = sshll.u32 %s220_s1, 4  ;;  %s110_s21 = sshll.u32 %s251_s2, 4  ;;  %s109_s18 = int_to_ptr.vmem [resolvable:$true] %s108_s18  ;;  %s111_s21 = int_to_ptr.hbm [resolvable:$true] %s110_s21 }
   0xa   :  { %v30_v7 = vadd.f32 %v29_v5, %v28_v3 }
   0xc   :  { %v31_v10 = vrot.slane %v30_v7, 2 }
   0xd   :  { %v131_v1 = vpop.eup %130 }
   0xe   :  { %v36_v4 = vmul.f32 8.0, %v131_v1  ;;  %v32_v12 = vadd.f32 %v31_v10, %v30_v7  ;;  %vm40_vm1 = vweird.f32 %v131_v1  ;;  %v133_v14 = vpop.eup %132 }
   0xf   :  { %v53_v18 = vmul.f32 7.0, %v133_v14  ;;  %vm57_vm3 = vweird.f32 %v133_v14 }
  0x10   :  { %v37_v6 = vsub.f32 1.0, %v36_v4  ;;  %v33_v13 = vrot.slane %v32_v12, 1 }
  0x11   :  { %v54_v22 = vsub.f32 1.0, %v53_v18 }
  0x12   :  { %v38_v8 = vmul.f32 %v131_v1, %v37_v6  ;;  %v34_v16 = vadd.f32 %v33_v13, %v32_v12 }
  0x13   :  { %v55_v25 = vmul.f32 %v133_v14, %v54_v22 }
  0x14   :  { %v39_v11 = vadd.f32 %v131_v1, %v38_v8 }
  0x15   :  { %v56_v28 = vadd.f32 %v133_v14, %v55_v25 }
  0x16   :  { %v41_v15 = vsel %vm40_vm1, %v131_v1, %v39_v11 }
  0x17   :  { %v42_v17 = vmul.f32 %v41_v15, %v34_v16  ;;  %v58_v31 = vsel %vm57_vm3, %v133_v14, %v56_v28 }
  0x19   :  { %v43_v19 = vsub.f32 %v26_v2, %v42_v17  ;;  %v72_v20 = vsub.f32 0.0, %v42_v17 }
  0x1b   :  { %v44_v21 = vmul.f32 %v43_v19, %v43_v19  ;;  %74 = vst.msk [vmem:[#allocation5] sm:$0x1] %vm73_vm2, %v72_v20 }
  0x1c   :  { %102 = dma.vmem_to_hbm [thread:$0]  %s98_s14, 16, %s100_s17, [#allocation4]  }
  0x1d   :  { %v45_v23 = vsel %vm27_vm0, %v44_v21, 0.0 }
  0x1e   :  { %v46_v24 = vrot.slane %v45_v23, 4 }
  0x20   :  { %v47_v26 = vadd.f32 %v46_v24, %v45_v23 }
  0x22   :  { %v48_v27 = vrot.slane %v47_v26, 2 }
  0x24   :  { %v49_v29 = vadd.f32 %v48_v27, %v47_v26 }
  0x26   :  { %v50_v30 = vrot.slane %v49_v29, 1 }
  0x28   :  { %v51_v32 = vadd.f32 %v50_v30, %v49_v29 }
  0x2a   :  { %v59_v33 = vmul.f32 %v58_v31, %v51_v32 }
  0x2c   :  { %134 = vrsqrt.f32 %v59_v33  ;;  %vm67_vm4 = vcmp.eq.f32.partialorder %v59_v33, inf  ;;  %v70_v40 = vand.u32 2147483648, %v59_v33  ;;  %vm69_vm5 = vcmp.eq.f32.partialorder %v59_v33, 0.0 }
  0x32   :  { %v135_v34 = vpop.eup %134 }
  0x33   :  { %v61_v35 = vmul.f32 %v135_v34, %v59_v33 }
  0x35   :  { %v62_v36 = vmul.f32 %v135_v34, %v61_v35 }
  0x37   :  { %v63_v37 = vmul.f32 0.5, %v62_v36 }
  0x39   :  { %v64_v38 = vsub.f32 1.5, %v63_v37 }
  0x3b   :  { %v65_v39 = vmul.f32 %v135_v34, %v64_v38 }
  0x3d   :  { %v66_v41 = vmul.f32 %v65_v39, %v59_v33 }
  0x3f   :  { %v68_v42 = vsel %vm67_vm4, %v59_v33, %v66_v41 }
  0x40   :  { %v71_v43 = vsel %vm69_vm5, %v70_v40, %v68_v42 }
  0x41   :  { %v75_v44 = vadd.f32 1e-06, %v71_v43 }
  0x43   :  { %136 = vrcp.f32 %v75_v44  ;;  %v87_v47 = vand.u32 2147483648, %v75_v44  ;;  %vm81_vm6 = vweird.f32 %v75_v44  ;;  %v85_v49 = vand.u32 2147483647, %v75_v44 }
  0x45   :  { %v88_v51 = vor.u32 1.1754944e-38, %v87_v47  ;;  %vm86_vm9 = vcmp.eq.f32.partialorder %v85_v49, 8.507059e+37 }
  0x49   :  { %v137_v45 = vpop.eup %136 }
  0x4a   :  { %v77_v46 = vmul.f32 %v137_v45, %v75_v44  ;;  %vm82_vm7 = vweird.f32 %v137_v45 }
  0x4b   :  { %vm83_vm8 = vmor %vm81_vm6, %vm82_vm7 }
  0x4c   :  { %v78_v48 = vsub.f32 1.0, %v77_v46 }
  0x4e   :  { %v79_v50 = vmul.f32 %v137_v45, %v78_v48 }
  0x50   :  { %v80_v52 = vadd.f32 %v137_v45, %v79_v50 }
  0x52   :  { %v84_v53 = vsel %vm83_vm8, %v137_v45, %v80_v52 }
  0x53   :  { %v89_v54 = vsel %vm86_vm9, %v88_v51, %v84_v53 }
  0x54   :  { %91 = vst.msk [vmem:[#allocation6] sm:$0x1] %vm73_vm2, %v89_v54 }
  0x55   :  { %113 = dma.vmem_to_hbm [thread:$0]  %s109_s18, 16, %s111_s21, [#allocation7]  }
  0x56   :  { %212 = dma.done.wait [#allocation4], 16  }
  0x57   :  { %213 = vsyncadd [#allocation4], 4294967280 }
  0x58   :  { %214 = dma.done.wait [#allocation7], 16  }
  0x59   :  { %215 = vsyncadd [#allocation7], 4294967280 }
  0x5a   :  { %122 = vsyncpa [#allocation3], 1 }
  0x5b   :  { %123 = vsyncpa [#allocation4], 1 }
  0x5c   :  { %124 = vsyncpa [#allocation7], 1 }

</bundles_post_ra>
